<compile_context>
chip_gen: v5e
topology: v5e:2x2
jax: 0.10.0
libtpu: 0.0.40
codegen_flags: <defaults>
</compile_context>

<pallas_src>
import jax
import jax.numpy as jnp
from jax.experimental import pallas as pl
from jax.experimental.pallas import tpu as pltpu

LANE = 128
SUBLANE = 8


def _round_up(x, m):
    return (x + m - 1) // m * m


def _pad2(a, rows, cols):
    r, c = a.shape
    return jnp.pad(a, ((0, rows - r), (0, cols - c)))


# ----------------------------------------------------------------------------
# Rule phase: rule_out = r2v @ x ; rule_out = r2r[s] @ rule_out + rule_out
# Grid: (Np // nk,)  -- K reduction over the node dimension.
# ----------------------------------------------------------------------------
def _rule_kernel_hops(r2v_ref, r2r_ref, x_ref, rule_ref, acc_ref):
    k = pl.program_id(0)

    @pl.when(k == 0)
    def _init():
        acc_ref[...] = jnp.zeros_like(acc_ref)

    acc_ref[...] += jnp.dot(r2v_ref[...], x_ref[...],
                            preferred_element_type=jnp.float32)

    @pl.when(k == pl.num_programs(0) - 1)
    def _finalize():
        rule = acc_ref[...]
        # Chained rule-to-rule hops with self-accumulation (static unroll; the
        # hop count `step` is small and known at trace time).
        for s in range(r2r_ref.shape[0]):
            rule = jnp.dot(r2r_ref[s], rule.astype(r2r_ref.dtype),
                           preferred_element_type=jnp.float32) + rule
        rule_ref[...] = rule.astype(rule_ref.dtype)   # stored once, as bf16


def _rule_kernel_nohops(r2v_ref, x_ref, rule_ref, acc_ref):
    k = pl.program_id(0)

    @pl.when(k == 0)
    def _init():
        acc_ref[...] = jnp.zeros_like(acc_ref)

    acc_ref[...] += jnp.dot(r2v_ref[...], x_ref[...],
                            preferred_element_type=jnp.float32)

    @pl.when(k == pl.num_programs(0) - 1)
    def _finalize():
        rule_ref[...] = acc_ref[...].astype(rule_ref.dtype)


# ----------------------------------------------------------------------------
# Row phase: out = v2r @ rule_out + v2v @ x
# Grid: (Mp // tm, Np // nk)  -- (parallel row tiles, arbitrary K reduction).
# ----------------------------------------------------------------------------
def _row_kernel(v2r_ref, rule_ref, v2v_ref, x_ref, o_ref, acc_ref):
    k = pl.program_id(1)

    @pl.when(k == 0)
    def _init():
        # Initialise the accumulator with the (small) v2r @ rule_out term.
        acc_ref[...] = jnp.dot(v2r_ref[...], rule_ref[...],
                               preferred_element_type=jnp.float32)

    acc_ref[...] += jnp.dot(v2v_ref[...], x_ref[...],
                            preferred_element_type=jnp.float32)

    @pl.when(k == pl.num_programs(1) - 1)
    def _finalize():
        o_ref[...] = acc_ref[...].astype(o_ref.dtype)


def _row_phase_vmem_bytes(tm, nk, Rp, Fp):
    bf2, f4 = 2, 4
    b = 2 * tm * Rp * bf2        # v2r row tiles (double-buffered)
    b += 2 * Rp * Fp * bf2       # rule_out (constant block, still 2 buffers)
    b += 2 * tm * nk * bf2       # v2v tiles
    b += 2 * nk * Fp * bf2       # x tiles
    b += 2 * tm * Fp * f4        # output tiles
    b += tm * Fp * f4            # f32 accumulator scratch
    return b


def compressgnn_spmm_forward(graph, x_j, *, tm_max=256, nk_max=1024):
    """Fused Pallas implementation of Compressgnn_SPMM.forward."""
    r2v = graph["r2v"]
    v2r = graph["v2r"]
    v2v = graph["v2v"]
    step = int(graph["step"])
    r2r_list = list(graph["r2r"])[:step]

    N, F = x_j.shape
    R = r2v.shape[0]

    # Lane-dense padding: feature, rule and contraction dims to multiples of 128.
    Fp = _round_up(F, LANE)
    Rp = _round_up(R, LANE)
    nk = min(nk_max, _round_up(N, LANE))      # K chunk over the node dim
    Np = _round_up(N, nk)                     # padded contraction extent
    tm = min(tm_max, _round_up(N, SUBLANE))   # output row tile
    Mp = _round_up(N, tm)                     # padded output rows

    bf = jnp.bfloat16
    x_p = _pad2(x_j.astype(bf), Np, Fp)
    r2v_p = _pad2(r2v.astype(bf), Rp, Np)
    v2r_p = _pad2(v2r.astype(bf), Mp, Rp)
    v2v_p = _pad2(v2v.astype(bf), Mp, Np)

    # ------------------------------------------------------------------ rule
    if r2r_list:
        r2r_p = jnp.stack([_pad2(m.astype(bf), Rp, Rp) for m in r2r_list])
        S = r2r_p.shape[0]
        rule_kernel = _rule_kernel_hops
        rule_in_specs = [
            pl.BlockSpec((Rp, nk), lambda k: (0, k)),         # r2v K-tile
            pl.BlockSpec((S, Rp, Rp), lambda k: (0, 0, 0)),   # r2r stack (small)
            pl.BlockSpec((nk, Fp), lambda k: (k, 0)),         # x K-tile
        ]
        rule_args = (r2v_p, r2r_p, x_p)
    else:
        rule_kernel = _rule_kernel_nohops
        rule_in_specs = [
            pl.BlockSpec((Rp, nk), lambda k: (0, k)),         # r2v K-tile
            pl.BlockSpec((nk, Fp), lambda k: (k, 0)),         # x K-tile
        ]
        rule_args = (r2v_p, x_p)

    rule_out = pl.pallas_call(
        rule_kernel,
        out_shape=jax.ShapeDtypeStruct((Rp, Fp), bf),
        grid_spec=pltpu.PrefetchScalarGridSpec(
            num_scalar_prefetch=0,
            grid=(Np // nk,),
            in_specs=rule_in_specs,
            out_specs=pl.BlockSpec((Rp, Fp), lambda k: (0, 0)),
            scratch_shapes=[pltpu.VMEM((Rp, Fp), jnp.float32)],
        ),
        compiler_params=pltpu.CompilerParams(
            dimension_semantics=("arbitrary",),   # K reduction into scratch
        ),
    )(*rule_args)

    # ------------------------------------------------------------------- row
    needed = _row_phase_vmem_bytes(tm, nk, Rp, Fp)
    vmem_limit = int(min(56 << 20, max(32 << 20, needed + (8 << 20))))

    flops = 2 * Fp * (Mp * Rp + Mp * Np)
    bytes_accessed = (2 * (v2r_p.size + Rp * Fp + v2v_p.size + x_p.size)
                      + 4 * Mp * Fp)

    out_p = pl.pallas_call(
        _row_kernel,
        out_shape=jax.ShapeDtypeStruct((Mp, Fp), jnp.float32),
        grid_spec=pltpu.PrefetchScalarGridSpec(
            num_scalar_prefetch=0,
            grid=(Mp // tm, Np // nk),
            in_specs=[
                pl.BlockSpec((tm, Rp), lambda i, k: (i, 0)),   # v2r row tile
                pl.BlockSpec((Rp, Fp), lambda i, k: (0, 0)),   # rule_out (const)
                pl.BlockSpec((tm, nk), lambda i, k: (i, k)),   # v2v streamed
                pl.BlockSpec((nk, Fp), lambda i, k: (k, 0)),   # x streamed
            ],
            out_specs=pl.BlockSpec((tm, Fp), lambda i, k: (i, 0)),
            scratch_shapes=[pltpu.VMEM((tm, Fp), jnp.float32)],
        ),
        compiler_params=pltpu.CompilerParams(
            # Row tiles are independent -> parallel (v7x megacore); the
            # K-reduction into the accumulator scratch must stay arbitrary.
            dimension_semantics=("parallel", "arbitrary"),
            vmem_limit_bytes=vmem_limit,
        ),
        cost_estimate=pl.CostEstimate(
            flops=int(flops),
            transcendentals=0,
            bytes_accessed=int(bytes_accessed),
        ),
    )(v2r_p, rule_out, v2v_p, x_p)

    return out_p[:N, :F]


# ----------------------------------------------------------------------------
# Test harness
# ----------------------------------------------------------------------------
def _make_sparse(key, shape, p=0.25):
    """Deterministic synthetic sparse adjacency (dense storage)."""
    km, kv = jax.random.split(key)
    mask = jax.random.bernoulli(km, p, shape).astype(jnp.float32)
    vals = jax.random.uniform(kv, shape, dtype=jnp.float32)
    return mask * vals


def _reference(graph, x_j):
    """Pure-JAX reference using the same bf16-input / f32-accumulate recipe."""
    bf = jnp.bfloat16
    xb = x_j.astype(bf)
    rule = jnp.dot(graph["r2v"].astype(bf), xb,
                   preferred_element_type=jnp.float32)
    for i in range(graph["step"]):
        rule = jnp.dot(graph["r2r"][i].astype(bf), rule.astype(bf),
                       preferred_element_type=jnp.float32) + rule
    out = jnp.dot(graph["v2r"].astype(bf), rule.astype(bf),
                  preferred_element_type=jnp.float32)
    out = out + jnp.dot(graph["v2v"].astype(bf), xb,
                        preferred_element_type=jnp.float32)
    return out


if __name__ == "__main__":
    # Small synthetic sizes: N nodes, R rules, F feature dim, `step` r2r hops.
    N, R, F, STEP = 64, 32, 32, 2

    key = jax.random.PRNGKey(0)
    k_x, k_v2v, k_v2r, k_r2v, k_r2r0, k_r2r1 = jax.random.split(key, 6)

    x_j = jax.random.normal(k_x, (N, F), dtype=jnp.float32)

    graph = {
        "step": STEP,
        "v2v": _make_sparse(k_v2v, (N, N)),        # node <- node
        "v2r": _make_sparse(k_v2r, (N, R)),        # node <- rule
        "r2v": _make_sparse(k_r2v, (R, N)),        # rule <- node
        "r2r": [
            _make_sparse(k_r2r0, (R, R)),          # rule <- rule, hop 0
            _make_sparse(k_r2r1, (R, R)),          # rule <- rule, hop 1
        ],
    }

    out = compressgnn_spmm_forward(graph, x_j)
    out = jax.block_until_ready(out)

    ref = _reference(graph, x_j)

    assert out.shape == (N, F)
    assert jnp.allclose(out, ref, atol=1e-2, rtol=1e-2), "mismatch vs reference"

    # Also exercise the step == 0 (no r2r hop) path.
    graph0 = dict(graph, step=0, r2r=[])
    out0 = jax.block_until_ready(compressgnn_spmm_forward(graph0, x_j))
    ref0 = _reference(graph0, x_j)
    assert jnp.allclose(out0, ref0, atol=1e-2, rtol=1e-2), "mismatch (step=0)"

    print("KERNEL_OK")
</pallas_src>

<mosaic_0001>
module attributes {stable_mosaic.version = 11 : i64} {
  func.func @_rule_kernel_hops(%arg0: i32, %arg1: memref<128x128xbf16, #tpu.memory_space<vmem>>, %arg2: memref<2x128x128xbf16, #tpu.memory_space<vmem>>, %arg3: memref<128x128xbf16, #tpu.memory_space<vmem>>, %arg4: memref<128x128xbf16, #tpu.memory_space<vmem>>, %arg5: memref<128x128xf32, #tpu.memory_space<vmem>>) attributes {dimension_semantics = [#tpu.dimension_semantics<arbitrary>], iteration_bounds = array<i64: 1>, scalar_prefetch = 0 : i64, scratch_operands = 1 : i64, tpu.core_type = #tpu.core_type<tc>, window_params = [{transform_indices = @transform_0, window_bounds = array<i64: 128, 128>}, {pipeline_mode = #tpu.pipeline_mode<synchronous>, transform_indices = @transform_1, window_bounds = array<i64: 2, 128, 128>}, {transform_indices = @transform_2, window_bounds = array<i64: 128, 128>}, {pipeline_mode = #tpu.pipeline_mode<synchronous>, transform_indices = @transform_3, window_bounds = array<i64: 128, 128>}]} {
    %c0_i32 = arith.constant 0 : i32
    %0 = arith.cmpi eq, %arg0, %c0_i32 : i32
    %1 = arith.extui %0 : i1 to i32
    %c0_i32_0 = arith.constant 0 : i32
    %2 = arith.cmpi ne, %1, %c0_i32_0 : i32
    scf.if %2 {
      %cst_10 = arith.constant 0.000000e+00 : f32
      %12 = vector.broadcast %cst_10 : f32 to vector<128x128xf32>
      %c0_11 = arith.constant 0 : index
      %c0_12 = arith.constant 0 : index
      %13 = vector.load %arg5[%c0_11, %c0_12] : memref<128x128xf32, #tpu.memory_space<vmem>>, vector<128x128xf32>
      tpu.vector_store %arg5[%c0_11, %c0_12], %12 {strides = array<i32>} : memref<128x128xf32, #tpu.memory_space<vmem>>, vector<128x128xf32>,
    } else {
    }
    %c0 = arith.constant 0 : index
    %c0_1 = arith.constant 0 : index
    %3 = vector.load %arg5[%c0, %c0_1] : memref<128x128xf32, #tpu.memory_space<vmem>>, vector<128x128xf32>
    %c0_2 = arith.constant 0 : index
    %c0_3 = arith.constant 0 : index
    %4 = vector.load %arg1[%c0_2, %c0_3] : memref<128x128xbf16, #tpu.memory_space<vmem>>, vector<128x128xbf16>
    %c0_4 = arith.constant 0 : index
    %c0_5 = arith.constant 0 : index
    %5 = vector.load %arg3[%c0_4, %c0_5] : memref<128x128xbf16, #tpu.memory_space<vmem>>, vector<128x128xbf16>
    %cst = arith.constant dense<0.000000e+00> : vector<128x128xf32>
    %6 = tpu.matmul %4, %5, %cst {dimension_numbers = #tpu.dot_dimension_numbers<[1], [0], [0], [1], [0, 0, 1, 1], [], []>} : vector<128x128xbf16>, vector<128x128xbf16>, vector<128x128xf32> -> vector<128x128xf32>
    %7 = arith.addf %3, %6 : vector<128x128xf32>
    %c0_6 = arith.constant 0 : index
    %c0_7 = arith.constant 0 : index
    %8 = vector.load %arg5[%c0_6, %c0_7] : memref<128x128xf32, #tpu.memory_space<vmem>>, vector<128x128xf32>
    tpu.vector_store %arg5[%c0_6, %c0_7], %7 {strides = array<i32>} : memref<128x128xf32, #tpu.memory_space<vmem>>, vector<128x128xf32>,
    %c0_i32_8 = arith.constant 0 : i32
    %9 = arith.cmpi eq, %arg0, %c0_i32_8 : i32
    %10 = arith.extui %9 : i1 to i32
    %c0_i32_9 = arith.constant 0 : i32
    %11 = arith.cmpi ne, %10, %c0_i32_9 : i32
    scf.if %11 {
      %c0_10 = arith.constant 0 : index
      %c0_11 = arith.constant 0 : index
      %12 = vector.load %arg5[%c0_10, %c0_11] : memref<128x128xf32, #tpu.memory_space<vmem>>, vector<128x128xf32>
      %c0_12 = arith.constant 0 : index
      %c0_13 = arith.constant 0 : index
      %c0_14 = arith.constant 0 : index
      %13 = vector.load %arg2[%c0_12, %c0_13, %c0_14] : memref<2x128x128xbf16, #tpu.memory_space<vmem>>, vector<1x128x128xbf16>
      %14 = vector.shape_cast %13 : vector<1x128x128xbf16> to vector<128x128xbf16>
      %15 = arith.truncf %12 : vector<128x128xf32> to vector<128x128xbf16>
      %cst_15 = arith.constant dense<0.000000e+00> : vector<128x128xf32>
      %16 = tpu.matmul %14, %15, %cst_15 {dimension_numbers = #tpu.dot_dimension_numbers<[1], [0], [0], [1], [0, 0, 1, 1], [], []>} : vector<128x128xbf16>, vector<128x128xbf16>, vector<128x128xf32> -> vector<128x128xf32>
      %17 = arith.addf %16, %12 : vector<128x128xf32>
      %c1 = arith.constant 1 : index
      %c0_16 = arith.constant 0 : index
      %c0_17 = arith.constant 0 : index
      %18 = vector.load %arg2[%c1, %c0_16, %c0_17] : memref<2x128x128xbf16, #tpu.memory_space<vmem>>, vector<1x128x128xbf16>
      %19 = vector.shape_cast %18 : vector<1x128x128xbf16> to vector<128x128xbf16>
      %20 = arith.truncf %17 : vector<128x128xf32> to vector<128x128xbf16>
      %cst_18 = arith.constant dense<0.000000e+00> : vector<128x128xf32>
      %21 = tpu.matmul %19, %20, %cst_18 {dimension_numbers = #tpu.dot_dimension_numbers<[1], [0], [0], [1], [0, 0, 1, 1], [], []>} : vector<128x128xbf16>, vector<128x128xbf16>, vector<128x128xf32> -> vector<128x128xf32>
      %22 = arith.addf %21, %17 : vector<128x128xf32>
      %23 = arith.truncf %22 : vector<128x128xf32> to vector<128x128xbf16>
      %c0_19 = arith.constant 0 : index
      %c0_20 = arith.constant 0 : index
      %24 = vector.load %arg4[%c0_19, %c0_20] : memref<128x128xbf16, #tpu.memory_space<vmem>>, vector<128x128xbf16>
      tpu.vector_store %arg4[%c0_19, %c0_20], %23 {strides = array<i32>} : memref<128x128xbf16, #tpu.memory_space<vmem>>, vector<128x128xbf16>,
    } else {
    }
    return
  }
  func.func @transform_0(%arg0: i32) -> (i32, i32) {
    %c0_i32 = arith.constant 0 : i32
    %c0_i32_0 = arith.constant 0 : i32
    return %c0_i32, %arg0 : i32, i32
  }
  func.func @transform_1(%arg0: i32) -> (i32, i32, i32) {
    %c0_i32 = arith.constant 0 : i32
    %c0_i32_0 = arith.constant 0 : i32
    %c0_i32_1 = arith.constant 0 : i32
    %c0_i32_2 = arith.constant 0 : i32
    return %c0_i32, %c0_i32_0, %c0_i32_1 : i32, i32, i32
  }
  func.func @transform_2(%arg0: i32) -> (i32, i32) {
    %c0_i32 = arith.constant 0 : i32
    %c0_i32_0 = arith.constant 0 : i32
    return %arg0, %c0_i32 : i32, i32
  }
  func.func @transform_3(%arg0: i32) -> (i32, i32) {
    %c0_i32 = arith.constant 0 : i32
    %c0_i32_0 = arith.constant 0 : i32
    %c0_i32_1 = arith.constant 0 : i32
    return %c0_i32, %c0_i32_0 : i32, i32
  }
}

</mosaic_0001>

<bundles_post_ra>
// kernel: tpu_custom_call.1
= control target key start
LH: loop header
LB: loop body
LE: loop exit
PB: predicated region body
PF: predicated region fallthrough
CT: control target
= control target key end

     0   :  { %8 = vsyncpa [#allocation4], 0  ;;  %s1098_s0 = inlined_call_operand.hbm [shape: bf16[128,128], index: 0, kind: input, shape index: {}]   ;;  %s1099_s1 = inlined_call_operand.hbm [shape: bf16[2,128,128], index: 1, kind: input, shape index: {}]   ;;  %s1100_s2 = inlined_call_operand.hbm [shape: bf16[128,128], index: 2, kind: input, shape index: {}]   ;;  %s1101_s3 = inlined_call_operand.hbm [shape: bf16[128,128], index: 3, kind: output, shape index: {}]  }
   0x1   :  { %9 = vsyncpa [#allocation7], 0 }
   0x2   :  { %10 = vsyncpa [#allocation5], 0  ;;  %s28_s14 = sshll.u32 %s1099_s1, 4  ;;  %s960_s15 = smov [#allocation6]   ;;  %s29_s14 = int_to_ptr.hbm [resolvable:$true] %s28_s14 }
   0x3   :  { %s30_s16 = sshll.u32 %s960_s15, 4  ;;  %s15_s19 = sshll.u32 %s1098_s0, 4  ;;  %s31_s16 = int_to_ptr.vmem [resolvable:$true] %s30_s16  ;;  %s16_s19 = int_to_ptr.hbm [resolvable:$true] %s15_s19 }
   0x4   :  { %s961_s20 = smov 64   ;;  %s962_s21 = smov 4  }
   0x5   :  { %36 = dma.hbm_to_vmem [thread:$0]  %s29_s14, 2048, %s31_s16, [#allocation7], %s961_s20, %s961_s20, %s962_s21  }
   0x6   :  { %s963_s22 = smov [#allocation3]   ;;  %s41_s1 = sshll.u32 %s1100_s2, 4  ;;  %s42_s1 = int_to_ptr.hbm [resolvable:$true] %s41_s1 }
   0x7   :  { %s17_s23 = sshll.u32 %s963_s22, 4  ;;  %s964_s0 = smov [#allocation8]   ;;  %s18_s23 = int_to_ptr.vmem [resolvable:$true] %s17_s23 }
   0x8   :  { %23 = dma.hbm_to_vmem [thread:$0]  %s16_s19, 1024, %s18_s23, [#allocation4], %s961_s20, %s961_s20, %s962_s21  }
   0x9   :  { %s43_s26 = sshll.u32 %s964_s0, 4  ;;  %s44_s26 = int_to_ptr.vmem [resolvable:$true] %s43_s26 }
   0xa   :  { %49 = dma.hbm_to_vmem [thread:$0]  %s42_s1, 1024, %s44_s26, [#allocation7], %s961_s20, %s961_s20, %s962_s21  }
   0xb   :  { %954 = dma.done.wait [#allocation4], 1024  }
   0xc   :  { %955 = vsyncadd [#allocation4], 4294966272 }
   0xd   :  { %956 = dma.done.wait [#allocation7], 3072  }
   0xe   :  { %957 = vsyncadd [#allocation7], 4294964224  ;;  %v764_v0 = vld [vmem:[#allocation8 + $0x38] sm:$0xff]  ;;  %v763_v1 = vld [vmem:[#allocation8 + $0x30] sm:$0xff]  ;;  %s965_s2 = smov [#allocation9]   ;;  %s607_s30 = sshll.u32 %s1101_s3, 4  ;;  %s608_s30 = int_to_ptr.hbm [resolvable:$true] %s607_s30 }
   0xf   :  { %226 = vmatpush.bf16.msra.mxu0 %v764_v0  ;;  %828 = vmatpush.bf16.msra.mxu3 %v764_v0  ;;  %v762_v2 = vld [vmem:[#allocation8 + $0x28] sm:$0xff]  ;;  %v761_v3 = vld [vmem:[#allocation8 + $0x20] sm:$0xff]  ;;  %v760_v4 = vld [vmem:[#allocation8 + $0x18] sm:$0xff]  ;;  %s605_s27 = sshll.u32 %s965_s2, 4  ;;  %s606_s27 = int_to_ptr.vmem [resolvable:$true] %s605_s27 }
  0x10   :  { %v759_v5 = vld [vmem:[#allocation8 + $0x10] sm:$0xff]  ;;  %v758_v6 = vld [vmem:[#allocation8 + $0x8] sm:$0xff]  ;;  %v757_v7 = vld [vmem:[#allocation8] sm:$0xff] }
  0x11   :  { %v749_v8 = vld [vmem:[#allocation3] sm:$0xff]  ;;  %v755_v9 = vld [vmem:[#allocation3 + $0x30] sm:$0xff]  ;;  %v750_v10 = vld [vmem:[#allocation3 + $0x8] sm:$0xff] }
  0x12   :  { %v756_v11 = vld [vmem:[#allocation3 + $0x38] sm:$0xff]  ;;  %v751_v12 = vld [vmem:[#allocation3 + $0x10] sm:$0xff]  ;;  %v753_v14 = vld [vmem:[#allocation3 + $0x20] sm:$0xff] }
  0x13   :  { %227 = vmatpush.bf16.msra.mxu0 %v763_v1  ;;  %829 = vmatpush.bf16.msra.mxu3 %v763_v1  ;;  %v752_v13 = vld [vmem:[#allocation3 + $0x18] sm:$0xff]  ;;  %v754_v15 = vld [vmem:[#allocation3 + $0x28] sm:$0xff]  ;;  %v765_v40 = vld [vmem:[#allocation6] sm:$0xff] }
  0x14   :  { %v771_v41 = vld [vmem:[#allocation6 + $0x30] sm:$0xff]  ;;  %v766_v42 = vld [vmem:[#allocation6 + $0x8] sm:$0xff]  ;;  %v772_v43 = vld [vmem:[#allocation6 + $0x38] sm:$0xff] }
  0x15   :  { %v767_v44 = vld [vmem:[#allocation6 + $0x10] sm:$0xff]  ;;  %v768_v45 = vld [vmem:[#allocation6 + $0x18] sm:$0xff]  ;;  %v769_v46 = vld [vmem:[#allocation6 + $0x20] sm:$0xff] }
  0x16   :  { %v770_v47 = vld [vmem:[#allocation6 + $0x28] sm:$0xff] }
  0x17   :  { %228 = vmatpush.bf16.msra.mxu0 %v762_v2  ;;  %830 = vmatpush.bf16.msra.mxu3 %v762_v2 }
  0x1b   :  { %229 = vmatpush.bf16.msra.mxu0 %v761_v3  ;;  %831 = vmatpush.bf16.msra.mxu3 %v761_v3 }
  0x1f   :  { %230 = vmatpush.bf16.msra.mxu0 %v760_v4  ;;  %832 = vmatpush.bf16.msra.mxu3 %v760_v4 }
  0x23   :  { %231 = vmatpush.bf16.msra.mxu0 %v759_v5  ;;  %833 = vmatpush.bf16.msra.mxu3 %v759_v5 }
  0x27   :  { %232 = vmatpush.bf16.msra.mxu0 %v758_v6  ;;  %834 = vmatpush.bf16.msra.mxu3 %v758_v6 }
  0x2b   :  { %233 = vmatpush.bf16.msra.mxu0 %v757_v7  ;;  %835 = vmatpush.bf16.msra.mxu3 %v757_v7 }
  0x2e   :  { %234 = vmatmul.bf16.vlgmr.msra.gmra.mxu0 %v749_v8  ;;  %264 = vmatmul.bf16.vlgmr.msra.gmra.mxu3 %v755_v9 }
  0x3e   :  { %239 = vmatmul.bf16.gmra.mxu0 %v750_v10  ;;  %269 = vmatmul.bf16.gmra.mxu3 %v756_v11 }
  0x4e   :  { %244 = vmatmul.bf16.gmra.mxu0 %v751_v12 }
  0x5e   :  { %249 = vmatmul.bf16.gmra.mxu0 %v752_v13 }
  0x6e   :  { %254 = vmatmul.bf16.gmra.mxu0 %v753_v14 }
  0x7e   :  { %259 = vmatmul.bf16.gmra.mxu0 %v754_v15 }
  0xab   :  { %v1004_v16 = vpop.f32.mrf.mxu0 }
  0xb1   :  { %v1006_v17 = vpop.f32.mrf.mxu3 }
  0xb3   :  { %v1008_v18 = vpop.f32.mrf.mxu0 }
  0xb4   :  { %v342_v39 = vpack.c.bf16 %v1008_v18, %v1004_v16 }
  0xb9   :  { %v1010_v19 = vpop.f32.mrf.mxu3 }
  0xba   :  { %v348_v26 = vpack.c.bf16 %v1010_v19, %v1006_v17 }
  0xbb   :  { %v1012_v20 = vpop.f32.mrf.mxu0 }
  0xc1   :  { %v270_v21 = vpop.f32.mrf.mxu3 }
  0xc3   :  { %v1014_v22 = vpop.f32.mrf.mxu0 }
  0xc4   :  { %v343_v38 = vpack.c.bf16 %v1014_v22, %v1012_v20 }
  0xc9   :  { %v272_v23 = vpop.f32.mrf.mxu3 }
  0xca   :  { %v349_v24 = vpack.c.bf16 %v272_v23, %v270_v21 }
  0xcb   :  { %v1016_v25 = vpop.f32.mrf.mxu0 }
  0xcc   :  { %398 = vmatpush.bf16.msra.mxu1 %v349_v24  ;;  %836 = vmatpush.bf16.msrb.mxu3 %v349_v24 }
  0xd0   :  { %399 = vmatpush.bf16.msra.mxu1 %v348_v26  ;;  %837 = vmatpush.bf16.msrb.mxu3 %v348_v26 }
  0xd3   :  { %v1020_v27 = vpop.f32.mrf.mxu0 }
  0xd4   :  { %v344_v37 = vpack.c.bf16 %v1020_v27, %v1016_v25 }
  0xdb   :  { %v1022_v28 = vpop.f32.mrf.mxu0 }
  0xe3   :  { %v1024_v29 = vpop.f32.mrf.mxu0 }
  0xe4   :  { %v345_v36 = vpack.c.bf16 %v1024_v29, %v1022_v28 }
  0xeb   :  { %v1026_v30 = vpop.f32.mrf.mxu0 }
  0xf3   :  { %v1028_v31 = vpop.f32.mrf.mxu0 }
  0xf4   :  { %v346_v35 = vpack.c.bf16 %v1028_v31, %v1026_v30 }
  0xfb   :  { %v260_v32 = vpop.f32.mrf.mxu0 }
 0x103   :  { %v262_v33 = vpop.f32.mrf.mxu0 }
 0x104   :  { %v347_v34 = vpack.c.bf16 %v262_v33, %v260_v32 }
 0x106   :  { %400 = vmatpush.bf16.msra.mxu1 %v347_v34  ;;  %838 = vmatpush.bf16.msrb.mxu3 %v347_v34 }
 0x10a   :  { %401 = vmatpush.bf16.msra.mxu1 %v346_v35  ;;  %839 = vmatpush.bf16.msrb.mxu3 %v346_v35 }
 0x10e   :  { %402 = vmatpush.bf16.msra.mxu1 %v345_v36  ;;  %840 = vmatpush.bf16.msrb.mxu3 %v345_v36 }
 0x112   :  { %403 = vmatpush.bf16.msra.mxu1 %v344_v37  ;;  %841 = vmatpush.bf16.msrb.mxu3 %v344_v37 }
 0x116   :  { %404 = vmatpush.bf16.msra.mxu1 %v343_v38  ;;  %842 = vmatpush.bf16.msrb.mxu3 %v343_v38 }
 0x11a   :  { %405 = vmatpush.bf16.msra.mxu1 %v342_v39  ;;  %843 = vmatpush.bf16.msrb.mxu3 %v342_v39 }
 0x11d   :  { %406 = vmatmul.bf16.vlgmr.msra.gmra.mxu1 %v765_v40  ;;  %436 = vmatmul.bf16.vlgmr.msrb.gmra.mxu3 %v771_v41 }
 0x12d   :  { %411 = vmatmul.bf16.gmra.mxu1 %v766_v42  ;;  %441 = vmatmul.bf16.gmra.mxu3 %v772_v43 }
 0x13d   :  { %416 = vmatmul.bf16.gmra.mxu1 %v767_v44 }
 0x14d   :  { %421 = vmatmul.bf16.gmra.mxu1 %v768_v45 }
 0x15d   :  { %426 = vmatmul.bf16.gmra.mxu1 %v769_v46 }
 0x16d   :  { %431 = vmatmul.bf16.gmra.mxu1 %v770_v47 }
 0x19a   :  { %v407_v48 = vpop.f32.mrf.mxu1 }
 0x1a0   :  { %v437_v49 = vpop.f32.mrf.mxu3 }
 0x1a1   :  { %v1050_v61 = vadd.f32 %v437_v49, %v1006_v17 }
 0x1a2   :  { %v409_v50 = vpop.f32.mrf.mxu1 }
 0x1a3   :  { %v410_v24 = vadd.f32 %v409_v50, %v1008_v18  ;;  %v777_v18 = vld [vmem:[#allocation6 + $0x60] sm:$0xff] }
 0x1a8   :  { %v439_v51 = vpop.f32.mrf.mxu3 }
 0x1a9   :  { %v1045_v59 = vadd.f32 %v439_v51, %v1010_v19 }
 0x1aa   :  { %v412_v52 = vpop.f32.mrf.mxu1 }
 0x1ab   :  { %v470_v62 = vpack.c.bf16 %v1045_v59, %v1050_v61 }
 0x1b0   :  { %v442_v53 = vpop.f32.mrf.mxu3 }
 0x1b1   :  { %v1040_v56 = vadd.f32 %v442_v53, %v270_v21 }
 0x1b2   :  { %v414_v54 = vpop.f32.mrf.mxu1 }
 0x1b3   :  { %v415_v19 = vadd.f32 %v414_v54, %v1014_v22  ;;  %v774_v22 = vld [vmem:[#allocation6 + $0x48] sm:$0xff] }
 0x1b8   :  { %v444_v55 = vpop.f32.mrf.mxu3 }
 0x1b9   :  { %v1042_v57 = vadd.f32 %v444_v55, %v272_v23  ;;  %v413_v23 = vadd.f32 %v412_v52, %v1012_v20  ;;  %v775_v20 = vld [vmem:[#allocation6 + $0x50] sm:$0xff] }
 0x1ba   :  { %v417_v58 = vpop.f32.mrf.mxu1 }
 0x1bb   :  { %v471_v60 = vpack.c.bf16 %v1042_v57, %v1040_v56  ;;  %v418_v17 = vadd.f32 %v417_v58, %v1016_v25  ;;  %v465_v26 = vpack.c.bf16 %v415_v19, %v413_v23  ;;  %v780_v25 = vld [vmem:[#allocation6 + $0x78] sm:$0xff] }
 0x1bd   :  { %520 = vmatpush.bf16.msra.mxu2 %v471_v60  ;;  %844 = vmatpush.bf16.msra.mxu3 %v471_v60 }
 0x1c1   :  { %521 = vmatpush.bf16.msra.mxu2 %v470_v62  ;;  %845 = vmatpush.bf16.msra.mxu3 %v470_v62 }
 0x1c2   :  { %v419_v63 = vpop.f32.mrf.mxu1 }
 0x1c3   :  { %v420_v14 = vadd.f32 %v419_v63, %v1020_v27 }
 0x1c5   :  { %v466_v21 = vpack.c.bf16 %v420_v14, %v418_v17 }
 0x1ca   :  { %v422_v0 = vpop.f32.mrf.mxu1 }
 0x1cb   :  { %v1072_v13 = vadd.f32 %v422_v0, %v1022_v28  ;;  %v408_v28 = vadd.f32 %v407_v48, %v1004_v16  ;;  %v778_v16 = vld [vmem:[#allocation6 + $0x68] sm:$0xff] }
 0x1cd   :  { %v464_v27 = vpack.c.bf16 %v410_v24, %v408_v28 }
 0x1d2   :  { %v424_v1 = vpop.f32.mrf.mxu1 }
 0x1d3   :  { %v1067_v11 = vadd.f32 %v424_v1, %v1024_v29  ;;  %v773_v29 = vld [vmem:[#allocation6 + $0x40] sm:$0xff] }
 0x1d5   :  { %v467_v15 = vpack.c.bf16 %v1067_v11, %v1072_v13 }
 0x1da   :  { %v427_v2 = vpop.f32.mrf.mxu1 }
 0x1db   :  { %v1064_v10 = vadd.f32 %v427_v2, %v1026_v30  ;;  %v779_v30 = vld [vmem:[#allocation6 + $0x70] sm:$0xff] }
 0x1e2   :  { %v429_v3 = vpop.f32.mrf.mxu1 }
 0x1e3   :  { %v1059_v8 = vadd.f32 %v429_v3, %v1028_v31  ;;  %v776_v31 = vld [vmem:[#allocation6 + $0x58] sm:$0xff] }
 0x1e5   :  { %v468_v12 = vpack.c.bf16 %v1059_v8, %v1064_v10 }
 0x1ea   :  { %v432_v4 = vpop.f32.mrf.mxu1 }
 0x1eb   :  { %v1054_v6 = vadd.f32 %v432_v4, %v260_v32 }
 0x1f2   :  { %v434_v5 = vpop.f32.mrf.mxu1 }
 0x1f3   :  { %v1056_v7 = vadd.f32 %v434_v5, %v262_v33 }
 0x1f5   :  { %v469_v9 = vpack.c.bf16 %v1056_v7, %v1054_v6 }
 0x1f7   :  { %522 = vmatpush.bf16.msra.mxu2 %v469_v9  ;;  %846 = vmatpush.bf16.msra.mxu3 %v469_v9 }
 0x1fb   :  { %523 = vmatpush.bf16.msra.mxu2 %v468_v12  ;;  %847 = vmatpush.bf16.msra.mxu3 %v468_v12 }
 0x1ff   :  { %524 = vmatpush.bf16.msra.mxu2 %v467_v15  ;;  %848 = vmatpush.bf16.msra.mxu3 %v467_v15 }
 0x203   :  { %525 = vmatpush.bf16.msra.mxu2 %v466_v21  ;;  %849 = vmatpush.bf16.msra.mxu3 %v466_v21 }
 0x207   :  { %526 = vmatpush.bf16.msra.mxu2 %v465_v26  ;;  %850 = vmatpush.bf16.msra.mxu3 %v465_v26 }
 0x20b   :  { %527 = vmatpush.bf16.msra.mxu2 %v464_v27  ;;  %851 = vmatpush.bf16.msra.mxu3 %v464_v27 }
 0x20e   :  { %528 = vmatmul.bf16.vlgmr.msra.gmra.mxu2 %v773_v29  ;;  %558 = vmatmul.bf16.vlgmr.msra.gmra.mxu3 %v779_v30 }
 0x21e   :  { %533 = vmatmul.bf16.gmra.mxu2 %v774_v22  ;;  %563 = vmatmul.bf16.gmra.mxu3 %v780_v25 }
 0x22e   :  { %538 = vmatmul.bf16.gmra.mxu2 %v775_v20 }
 0x23e   :  { %543 = vmatmul.bf16.gmra.mxu2 %v776_v31 }
 0x24e   :  { %548 = vmatmul.bf16.gmra.mxu2 %v777_v18 }
 0x25e   :  { %553 = vmatmul.bf16.gmra.mxu2 %v778_v16 }
 0x291   :  { %v529_v32 = vpop.f32.mrf.mxu2  ;;  %v559_v33 = vpop.f32.mrf.mxu3 }
 0x292   :  { %v530_v36 = vadd.f32 %v529_v32, %v408_v28  ;;  %v560_v37 = vadd.f32 %v559_v33, %v1050_v61 }
 0x299   :  { %v531_v34 = vpop.f32.mrf.mxu2  ;;  %v561_v35 = vpop.f32.mrf.mxu3 }
 0x29a   :  { %v532_v38 = vadd.f32 %v531_v34, %v410_v24  ;;  %v562_v39 = vadd.f32 %v561_v35, %v1045_v59 }
 0x29c   :  { %v784_v40 = vpack.c.bf16 %v532_v38, %v530_v36  ;;  %v814_v41 = vpack.c.bf16 %v562_v39, %v560_v37 }
 0x29e   :  { %785 = vst [vmem:[#allocation9] sm:$0xff] %v784_v40  }
 0x29f   :  { %826 = vst [vmem:[#allocation9 + $0x30] sm:$0xff] %v814_v41  }
 0x2a1   :  { %v534_v42 = vpop.f32.mrf.mxu2  ;;  %v564_v43 = vpop.f32.mrf.mxu3 }
 0x2a2   :  { %v535_v46 = vadd.f32 %v534_v42, %v413_v23  ;;  %v565_v47 = vadd.f32 %v564_v43, %v1040_v56 }
 0x2a9   :  { %v536_v44 = vpop.f32.mrf.mxu2  ;;  %v566_v45 = vpop.f32.mrf.mxu3 }
 0x2aa   :  { %v537_v48 = vadd.f32 %v536_v44, %v415_v19  ;;  %v567_v49 = vadd.f32 %v566_v45, %v1042_v57 }
 0x2ac   :  { %v789_v50 = vpack.c.bf16 %v537_v48, %v535_v46  ;;  %v819_v51 = vpack.c.bf16 %v567_v49, %v565_v47 }
 0x2ae   :  { %821 = vst [vmem:[#allocation9 + $0x8] sm:$0xff] %v789_v50  }
 0x2af   :  { %827 = vst [vmem:[#allocation9 + $0x38] sm:$0xff] %v819_v51  }
 0x2b1   :  { %v539_v52 = vpop.f32.mrf.mxu2 }
 0x2b2   :  { %v540_v54 = vadd.f32 %v539_v52, %v418_v17 }
 0x2b9   :  { %v541_v53 = vpop.f32.mrf.mxu2 }
 0x2ba   :  { %v542_v55 = vadd.f32 %v541_v53, %v420_v14 }
 0x2bc   :  { %v794_v58 = vpack.c.bf16 %v542_v55, %v540_v54 }
 0x2be   :  { %822 = vst [vmem:[#allocation9 + $0x10] sm:$0xff] %v794_v58  }
 0x2c1   :  { %v544_v59 = vpop.f32.mrf.mxu2 }
 0x2c2   :  { %v545_v61 = vadd.f32 %v544_v59, %v1072_v13 }
 0x2c9   :  { %v546_v60 = vpop.f32.mrf.mxu2 }
 0x2ca   :  { %v547_v62 = vadd.f32 %v546_v60, %v1067_v11 }
 0x2cc   :  { %v799_v56 = vpack.c.bf16 %v547_v62, %v545_v61 }
 0x2ce   :  { %823 = vst [vmem:[#allocation9 + $0x18] sm:$0xff] %v799_v56  }
 0x2d1   :  { %v549_v63 = vpop.f32.mrf.mxu2 }
 0x2d2   :  { %v550_v0 = vadd.f32 %v549_v63, %v1064_v10 }
 0x2d9   :  { %v551_v57 = vpop.f32.mrf.mxu2 }
 0x2da   :  { %v552_v1 = vadd.f32 %v551_v57, %v1059_v8 }
 0x2dc   :  { %v804_v2 = vpack.c.bf16 %v552_v1, %v550_v0 }
 0x2de   :  { %824 = vst [vmem:[#allocation9 + $0x20] sm:$0xff] %v804_v2  }
 0x2e1   :  { %v554_v3 = vpop.f32.mrf.mxu2 }
 0x2e2   :  { %v555_v5 = vadd.f32 %v554_v3, %v1054_v6 }
 0x2e9   :  { %v556_v4 = vpop.f32.mrf.mxu2 }
 0x2ea   :  { %v557_v9 = vadd.f32 %v556_v4, %v1056_v7 }
 0x2ec   :  { %v809_v11 = vpack.c.bf16 %v557_v9, %v555_v5 }
 0x2ee   :  { %825 = vst [vmem:[#allocation9 + $0x28] sm:$0xff] %v809_v11  }
 0x2ef   :  { %613 = dma.vmem_to_hbm [thread:$0]  %s606_s27, 1024, %s608_s30, [#allocation5], %s961_s20, %s961_s20, %s962_s21  }
 0x2f0   :  { %958 = dma.done.wait [#allocation5], 1024  }
 0x2f1   :  { %959 = vsyncadd [#allocation5], 4294966272 }
 0x2f2   :  { %618 = vsyncpa [#allocation4], 1 }
 0x2f3   :  { %619 = vsyncpa [#allocation7], 1 }
 0x2f4   :  { %620 = vsyncpa [#allocation5], 1 }

</bundles_post_ra>
